<compile_context>
chip_gen: v6e
topology: v6e:2x2x1
jax: 0.10.0
libtpu: 0.0.40
codegen_flags: <defaults>
</compile_context>

<pallas_src>
import functools

import jax
import jax.numpy as jnp
from jax.experimental import pallas as pl
from jax.experimental.pallas import tpu as pltpu

P_DROP = 0.1     # dropout prob from the module default
TM_MAX = 256     # adj row-tile (sublane axis)
TN_MAX = 1024    # adj col-tile (lane axis) — wide, lane-dense stores


def _round_up(x, m):
    return ((x + m - 1) // m) * m


def _decoder_kernel(zi_ref, zj_ref, adj_ref):
    # bf16 tiles -> single-pass MXU; accumulate in f32.
    zi = zi_ref[...].astype(jnp.bfloat16)
    zj = zj_ref[...].astype(jnp.bfloat16)
    # logits = z_i @ z_j.T — contract the last dim of both operands directly
    # (no explicit transpose of z is materialized).
    logits = jax.lax.dot_general(
        zi, zj,
        dimension_numbers=(((1,), (1,)), ((), ())),
        preferred_element_type=jnp.float32,
    )
    # sigmoid(x) == 0.5 * tanh(0.5 * x) + 0.5 : exactly one EUP transcendental
    # per element (the muls/adds ride the VPU slots).
    adj_ref[...] = 0.5 * jnp.tanh(0.5 * logits) + 0.5


@functools.partial(jax.jit, static_argnames=("dropout", "training"))
def inner_product_decoder(z, key, *, dropout=P_DROP, training=True):
    """z: (N, D) f32, key: jax PRNG key -> adj: (N, N) f32 = sigmoid(drop(z) @ drop(z).T)."""
    n, d = z.shape

    # --- F.dropout(z, p): functional-dropout semantics (keep w.p. 1-p, scale
    # 1/(1-p)).  Applied once here so every (i, j) tile of z @ z.T sees the
    # same mask (keeps adj symmetric, like the PyTorch module).
    if training and dropout > 0.0:
        keep = jax.random.bernoulli(key, 1.0 - dropout, z.shape)
        z = jnp.where(keep, z * (1.0 / (1.0 - dropout)), 0.0).astype(z.dtype)

    # TODO(synk): the PyTorch forward also computes `t = z @ weight` but never
    # uses the result (dead code); it is intentionally not reproduced here.

    # Clamp tiles to the (aligned) problem size; Pallas masks ragged edges, so
    # no padding of z and no post-kernel slice copy of the (n, n) output.
    tm = min(TM_MAX, _round_up(n, 8))
    tn = min(TN_MAX, _round_up(n, 128))
    grid = (pl.cdiv(n, tm), pl.cdiv(n, tn))

    cost = pl.CostEstimate(
        flops=2 * n * n * d,
        transcendentals=n * n,
        bytes_accessed=4 * n * n + 2 * 4 * n * d,
    )

    adj = pl.pallas_call(
        _decoder_kernel,
        out_shape=jax.ShapeDtypeStruct((n, n), jnp.float32),
        grid_spec=pl.GridSpec(
            grid=grid,
            in_specs=[
                pl.BlockSpec((tm, d), lambda i, j: (i, 0)),   # z rows for row-tile i
                pl.BlockSpec((tn, d), lambda i, j: (j, 0)),   # z rows for col-tile j
            ],
            out_specs=pl.BlockSpec((tm, tn), lambda i, j: (i, j)),
        ),
        compiler_params=pltpu.CompilerParams(
            dimension_semantics=("parallel", "parallel"),
        ),
        cost_estimate=cost,
    )(z, z)

    return adj


if __name__ == "__main__":
    N, SIZE = 16, 32   # 16 nodes, latent dim 32 (module's `size`)

    key = jax.random.PRNGKey(0)
    kz, kw, kdrop = jax.random.split(key, 3)

    z = jax.random.normal(kz, (N, SIZE), dtype=jnp.float32)

    # xavier_uniform_ weight (SIZE, SIZE) — built for parity with the module,
    # but the forward's `z @ weight` result is dead code, so it is unused.
    bound = (6.0 / (SIZE + SIZE)) ** 0.5
    weight = jax.random.uniform(kw, (SIZE, SIZE), dtype=jnp.float32,
                                minval=-bound, maxval=bound)
    del weight  # intentionally unused (see TODO above)

    # Numerical sanity vs. a pure-JAX reference (no dropout so it is exact math).
    adj_eval = inner_product_decoder(z, kdrop, training=False)
    ref = jax.nn.sigmoid(z @ z.T)
    assert bool(jnp.allclose(adj_eval, ref, atol=5e-2)), "mismatch vs reference"

    # Forward-pass semantics of the module (dropout always applied).
    adj = inner_product_decoder(z, kdrop)
    adj = jax.block_until_ready(adj)

    assert adj.shape == (N, N) and adj.dtype == jnp.float32
    assert bool(jnp.all(jnp.isfinite(adj)))
    assert bool(jnp.all((adj >= 0.0) & (adj <= 1.0)))
    print("KERNEL_OK")
</pallas_src>

<mosaic_0001>
module attributes {stable_mosaic.version = 11 : i64} {
  func.func @_decoder_kernel(%arg0: i32, %arg1: i32, %arg2: memref<16x32xf32, #tpu.memory_space<vmem>>, %arg3: memref<128x32xf32, #tpu.memory_space<vmem>>, %arg4: memref<16x128xf32, #tpu.memory_space<vmem>>) attributes {dimension_semantics = [#tpu.dimension_semantics<parallel>, #tpu.dimension_semantics<parallel>], iteration_bounds = array<i64: 1, 1>, scalar_prefetch = 0 : i64, scratch_operands = 0 : i64, tpu.core_type = #tpu.core_type<tc>, window_params = [{transform_indices = @transform_0, window_bounds = array<i64: 16, 32>}, {transform_indices = @transform_1, window_bounds = array<i64: 128, 32>}, {transform_indices = @transform_2, window_bounds = array<i64: 16, 128>}]} {
    %c0 = arith.constant 0 : index
    %c0_0 = arith.constant 0 : index
    %0 = vector.load %arg2[%c0, %c0_0] : memref<16x32xf32, #tpu.memory_space<vmem>>, vector<16x32xf32>
    %1 = arith.truncf %0 : vector<16x32xf32> to vector<16x32xbf16>
    %c0_1 = arith.constant 0 : index
    %c0_2 = arith.constant 0 : index
    %2 = vector.load %arg3[%c0_1, %c0_2] : memref<128x32xf32, #tpu.memory_space<vmem>>, vector<128x32xf32>
    %3 = arith.truncf %2 : vector<128x32xf32> to vector<128x32xbf16>
    %cst = arith.constant dense<0.000000e+00> : vector<16x128xf32>
    %4 = tpu.matmul %1, %3, %cst {dimension_numbers = #tpu.dot_dimension_numbers<[1], [1], [0], [0], [0, 0, 1, 0], [], []>} : vector<16x32xbf16>, vector<128x32xbf16>, vector<16x128xf32> -> vector<16x128xf32>
    %cst_3 = arith.constant 5.000000e-01 : f32
    %5 = vector.broadcast %cst_3 : f32 to vector<16x128xf32>
    %6 = arith.mulf %5, %4 : vector<16x128xf32>
    %7 = math.tanh %6 : vector<16x128xf32>
    %cst_4 = arith.constant 5.000000e-01 : f32
    %8 = vector.broadcast %cst_4 : f32 to vector<16x128xf32>
    %9 = arith.mulf %8, %7 : vector<16x128xf32>
    %cst_5 = arith.constant 5.000000e-01 : f32
    %10 = vector.broadcast %cst_5 : f32 to vector<16x128xf32>
    %11 = arith.addf %9, %10 : vector<16x128xf32>
    %c0_6 = arith.constant 0 : index
    %c0_7 = arith.constant 0 : index
    %12 = vector.load %arg4[%c0_6, %c0_7] : memref<16x128xf32, #tpu.memory_space<vmem>>, vector<16x128xf32>
    tpu.vector_store %arg4[%c0_6, %c0_7], %11 {strides = array<i32>} : memref<16x128xf32, #tpu.memory_space<vmem>>, vector<16x128xf32>,
    return
  }
  func.func @transform_0(%arg0: i32, %arg1: i32) -> (i32, i32) {
    %c0_i32 = arith.constant 0 : i32
    %c0_i32_0 = arith.constant 0 : i32
    return %arg0, %c0_i32 : i32, i32
  }
  func.func @transform_1(%arg0: i32, %arg1: i32) -> (i32, i32) {
    %c0_i32 = arith.constant 0 : i32
    %c0_i32_0 = arith.constant 0 : i32
    return %arg1, %c0_i32 : i32, i32
  }
  func.func @transform_2(%arg0: i32, %arg1: i32) -> (i32, i32) {
    %c0_i32 = arith.constant 0 : i32
    return %arg0, %arg1 : i32, i32
  }
}

</mosaic_0001>

<bundles_post_ra>
// kernel: inner_product_decoder.1
= control target key start
LH: loop header
LB: loop body
LE: loop exit
PB: predicated region body
PF: predicated region fallthrough
CT: control target
= control target key end

     0   :  { %7 = vsyncpa [#allocation3], 0  ;;  %s321_s0 = inlined_call_operand.hbm [shape: f32[16,32], index: 0, kind: input, shape index: {}, may-alias: {0,1}]   ;;  %s322_s1 = inlined_call_operand.hbm [shape: f32[16,32], index: 1, kind: input, shape index: {}, may-alias: {0,1}]   ;;  %s323_s2 = inlined_call_operand.hbm [shape: f32[16,16], index: 2, kind: output, shape index: {}]  }
   0x1   :  { %8 = vsyncpa [#allocation6], 0 }
   0x2   :  { %9 = vsyncpa [#allocation4], 0  ;;  %s272_s9 = smov [#allocation2]  }
   0x3   :  { %s15_s10 = sshll.u32 %s272_s9, 4  ;;  %s16_s10 = int_to_ptr.vmem [resolvable:$true] %s15_s10 }
   0x4   :  { %s214_s11 = scalar_lea.vmem %s16_s10, 256  ;;  %p219_p1 = scmp.lt.s32.totalorder %s16_s10, %s16_s10 }
   0x5   :  { %p215_p0 = scmp.ne.s32.totalorder %s16_s10, %s214_s11  ;;  %p220_p2 = scmp.lt.s32.totalorder %s214_s11, %s214_s11 }
   0x7   :  { %p221_p3 = por %p220_p2, %p219_p1 }
   0x9   :  { %p222_p4 = pnand %p221_p3, %p215_p0 }
   0xb   :  { %225 = shalt.err (!%p222_p4)
}
   0xc   :  { %s273_s12 = smov 128   ;;  %s274_s13 = smov 8  }
   0xd   :  { %21 = dma.hbm_to_vmem [thread:$0]  %s321_s0, 256, %s16_s10, [#allocation3], %s273_s12, %s273_s12, %s274_s13  }
   0xe   :  { %26 = vsyncadd [#allocation6], 1792  ;;  %s275_s16 = smov [#allocation5]  }
   0xf   :  { %s27_s17 = sshll.u32 %s275_s16, 4  ;;  %s28_s17 = int_to_ptr.vmem [resolvable:$true] %s27_s17 }
  0x10   :  { %s234_s18 = scalar_lea.vmem %s28_s17, 256  ;;  %s238_s19 = scalar_lea.vmem %s28_s17, 2048 }
  0x11   :  { %p235_p5 = scmp.ne.s32.totalorder %s28_s17, %s234_s18  ;;  %p239_p6 = scmp.lt.s32.totalorder %s28_s17, %s28_s17 }
  0x12   :  { %p240_p7 = scmp.lt.s32.totalorder %s238_s19, %s234_s18 }
  0x14   :  { %p241_p8 = por %p240_p7, %p239_p6 }
  0x16   :  { %p242_p9 = pnand %p241_p8, %p235_p5 }
  0x18   :  { %245 = shalt.err (!%p242_p9)
}
  0x19   :  { %33 = dma.hbm_to_vmem [thread:$0]  %s322_s1, 256, %s28_s17, [#allocation6], %s273_s12, %s273_s12, %s274_s13  }
  0x1a   :  { %266 = dma.done.wait [#allocation3], 256  }
  0x1b   :  { %267 = vsyncadd [#allocation3], 4294967040 }
  0x1c   :  { %268 = dma.done.wait [#allocation6], 2048  }
  0x1d   :  { %269 = vsyncadd [#allocation6], 4294965248  ;;  %v276_v0 = vmov 0.0   ;;  %vm277_vm0 = vmmov 0   ;;  %v58_v1 = vld [vmem:[#allocation5 + $0x70] sm:$0xff]  ;;  %v59_v2 = vld [vmem:[#allocation5 + $0x78] sm:$0xff] }
  0x1e   :  { %175 = vmatprep.subr.bf16.mxu0 %v276_v0  ;;  %191 = vmatprep.mubr.msk.bf16.mxu0 %vm277_vm0, %v276_v0  ;;  %vm68_vm1 = vcmask 261120   ;;  %v67_v3 = vpack.c.bf16 %v59_v2, %v58_v1  ;;  %v56_v4 = vld [vmem:[#allocation5 + $0x60] sm:$0xff]  ;;  %v57_v5 = vld [vmem:[#allocation5 + $0x68] sm:$0xff]  ;;  %v54_v9 = vld [vmem:[#allocation5 + $0x50] sm:$0xff]  ;;  %s278_s0 = smov [#allocation7]  }
  0x1f   :  { %v66_v7 = vpack.c.bf16 %v57_v5, %v56_v4  ;;  %v55_v10 = vld [vmem:[#allocation5 + $0x58] sm:$0xff]  ;;  %v52_v13 = vld [vmem:[#allocation5 + $0x40] sm:$0xff]  ;;  %v53_v14 = vld [vmem:[#allocation5 + $0x48] sm:$0xff]  ;;  %s152_s1 = sshll.u32 %s278_s0, 4  ;;  %s153_s1 = int_to_ptr.vmem [resolvable:$true] %s152_s1 }
  0x20   :  { %v94_v6 = vsel %vm68_vm1, %v67_v3, 0  ;;  %v65_v11 = vpack.c.bf16 %v55_v10, %v54_v9  ;;  %v64_v15 = vpack.c.bf16 %v53_v14, %v52_v13  ;;  %v50_v17 = vld [vmem:[#allocation5 + $0x30] sm:$0xff]  ;;  %v51_v18 = vld [vmem:[#allocation5 + $0x38] sm:$0xff]  ;;  %v48_v21 = vld [vmem:[#allocation5 + $0x20] sm:$0xff]  ;;  %s246_s22 = scalar_lea.vmem %s153_s1, 256  ;;  %p251_p11 = scmp.lt.s32.totalorder %s153_s1, %s153_s1 }
  0x21   :  { %176 = vmatpush3.bf16.xpose.msra.mxu0 %v94_v6  ;;  %v91_v8 = vsel %vm68_vm1, %v66_v7, 0  ;;  %v63_v19 = vpack.c.bf16 %v51_v18, %v50_v17  ;;  %v49_v22 = vld [vmem:[#allocation5 + $0x28] sm:$0xff]  ;;  %v46_v25 = vld [vmem:[#allocation5 + $0x10] sm:$0xff]  ;;  %v47_v26 = vld [vmem:[#allocation5 + $0x18] sm:$0xff]  ;;  %p247_p10 = scmp.ne.s32.totalorder %s153_s1, %s246_s22  ;;  %p252_p12 = scmp.lt.s32.totalorder %s246_s22, %s246_s22 }
  0x22   :  { %177 = vmatprep.subr.bf16.mxu0 %v276_v0  ;;  %v88_v12 = vsel %vm68_vm1, %v65_v11, 0  ;;  %v85_v16 = vsel %vm68_vm1, %v64_v15, 0  ;;  %v62_v23 = vpack.c.bf16 %v49_v22, %v48_v21  ;;  %v61_v27 = vpack.c.bf16 %v47_v26, %v46_v25  ;;  %v44_v29 = vld [vmem:[#allocation5] sm:$0xff]  ;;  %v45_v30 = vld [vmem:[#allocation5 + $0x8] sm:$0xff]  ;;  %v41_v33 = vld [vmem:[#allocation2] sm:$0xff] }
  0x23   :  { %v82_v20 = vsel %vm68_vm1, %v63_v19, 0  ;;  %v60_v31 = vpack.c.bf16 %v45_v30, %v44_v29  ;;  %v42_v34 = vld [vmem:[#allocation2 + $0x8] sm:$0xff]  ;;  %p253_p13 = por %p252_p12, %p251_p11 }
  0x24   :  { %v79_v24 = vsel %vm68_vm1, %v62_v23, 0  ;;  %v76_v28 = vsel %vm68_vm1, %v61_v27, 0  ;;  %v43_v35 = vpack.c.bf16 %v42_v34, %v41_v33 }
  0x25   :  { %v73_v32 = vsel %vm68_vm1, %v60_v31, 0  ;;  %p254_p0 = pnand %p253_p13, %p247_p10 }
  0x29   :  { %178 = vmatpush3.bf16.xpose.msra.mxu0 %v91_v8 }
  0x2a   :  { %179 = vmatprep.subr.bf16.mxu0 %v276_v0 }
  0x31   :  { %180 = vmatpush3.bf16.xpose.msra.mxu0 %v88_v12 }
  0x32   :  { %181 = vmatprep.subr.bf16.mxu0 %v276_v0 }
  0x39   :  { %182 = vmatpush3.bf16.xpose.msra.mxu0 %v85_v16 }
  0x3a   :  { %183 = vmatprep.subr.bf16.mxu0 %v276_v0 }
  0x41   :  { %184 = vmatpush3.bf16.xpose.msra.mxu0 %v82_v20 }
  0x42   :  { %185 = vmatprep.subr.bf16.mxu0 %v276_v0 }
  0x49   :  { %186 = vmatpush3.bf16.xpose.msra.mxu0 %v79_v24 }
  0x4a   :  { %187 = vmatprep.subr.bf16.mxu0 %v276_v0 }
  0x51   :  { %188 = vmatpush3.bf16.xpose.msra.mxu0 %v76_v28 }
  0x52   :  { %189 = vmatprep.subr.bf16.mxu0 %v276_v0 }
  0x59   :  { %190 = vmatpush3.bf16.xpose.msra.mxu0 %v73_v32 }
  0x60   :  { %192 = vmatmul.mubr.msk.bf16.vlgmr.msra.gmra.mxu0 %vm68_vm1, %v43_v35 }
 0x120   :  { %v130_v36 = vpop.f32.mrf.mxu0 }
 0x121   :  { %v137_v37 = vmul.f32 0.5, %v130_v36 }
 0x122   :  { %v193_v38 = vpop.f32.mrf.mxu0 }
 0x123   :  { %202 = vtanh.f32 %v137_v37 }
 0x124   :  { %v133_v39 = vpop.f32.mrf.mxu0 }
 0x125   :  { %v138_v40 = vmul.f32 0.5, %v133_v39 }
 0x126   :  { %v194_v41 = vpop.f32.mrf.mxu0 }
 0x127   :  { %204 = vtanh.f32 %v138_v40 }
 0x130   :  { %v203_v42 = vpop.eup %202 }
 0x131   :  { %v141_v43 = vmul.f32 0.5, %v203_v42 }
 0x133   :  { %v143_v44 = vadd.f32 0.5, %v141_v43 }
 0x134   :  { %v205_v45 = vpop.eup %204 }
 0x135   :  { %145 = vst [vmem:[#allocation7] sm:$0xff] %v143_v44  ;;  %v142_v46 = vmul.f32 0.5, %v205_v45 }
 0x137   :  { %v144_v47 = vadd.f32 0.5, %v142_v46 }
 0x139   :  { %146 = vst [vmem:[#allocation7 + $0x8] sm:$0xff] %v144_v47 }
 0x13a   :  { %257 = shalt.err (!%p254_p0)
}
 0x13b   :  { %158 = dma.vmem_to_hbm [thread:$0]  %s153_s1, 256, %s323_s2, [#allocation4], %s273_s12, %s273_s12, %s274_s13  }
 0x13c   :  { %270 = dma.done.wait [#allocation4], 256  }
 0x13d   :  { %271 = vsyncadd [#allocation4], 4294967040 }
 0x13e   :  { %162 = vsyncpa [#allocation3], 1 }
 0x13f   :  { %163 = vsyncpa [#allocation6], 1 }
 0x140   :  { %164 = vsyncpa [#allocation4], 1 }

</bundles_post_ra>
